<compile_context>
chip_gen: v6e
topology: v6e:2x2x1
jax: 0.10.0
libtpu: 0.0.40
codegen_flags: <defaults>
</compile_context>

<pallas_src>
import numpy as np
import jax
import jax.numpy as jnp
from jax import lax
from jax.experimental import pallas as pl
from jax.experimental.pallas import tpu as pltpu

EPS = 1e-5  # PyTorch BatchNorm2d default eps


def _fold_bn(g, b, m, v):
    s = g / jnp.sqrt(v + EPS)
    return s.astype(jnp.float32), (b - m * s).astype(jnp.float32)


def _band_weights(w_hwio, W):
    """(3, 3, Ci, Co) HWIO conv weights -> (3, W*Ci, W*Co) banded matrices.

    band[dy, p*Ci+ci, w*Co+co] = w_hwio[dy, p-w+1, ci, co] when |p-w| <= 1 else 0,
    so sum_dy (rows_dy @ band[dy]) == 3x3 conv, stride 1, zero pad 1 along W
    (W padding is implicit: out-of-range taps simply have no band entry).
    """
    _, _, Ci, Co = w_hwio.shape
    p = np.arange(W)[:, None]
    w = np.arange(W)[None, :]
    dx = p - w + 1                                            # (W, W)
    valid = jnp.asarray((dx >= 0) & (dx <= 2))
    dx_c = jnp.asarray(np.clip(dx, 0, 2))
    g = w_hwio[:, dx_c, :, :]                                 # (3, W, W, Ci, Co): [dy, p, w, ci, co]
    g = jnp.where(valid[None, :, :, None, None], g, 0.0)
    g = jnp.transpose(g, (0, 1, 3, 2, 4))                     # (3, p, ci, w, co)
    return g.reshape(3, W * Ci, W * Co)


def basic_block_forward(x_nchw, params, p_drop):
    """Runs the fused BasicBlock kernel. Input/output are NCHW float32."""
    N, Cin, H, W = x_nchw.shape
    x = jnp.transpose(x_nchw, (0, 2, 3, 1)).astype(jnp.float32)              # NHWC
    w1 = jnp.transpose(params["conv1_w"], (2, 3, 1, 0)).astype(jnp.float32)  # OIHW -> HWIO
    w2 = jnp.transpose(params["conv2_w"], (2, 3, 1, 0)).astype(jnp.float32)
    Cout = w1.shape[-1]
    assert Cout >= Cin, "PyramidNet BasicBlock expects planes >= inplanes"

    s1, b1 = _fold_bn(params["bn1_g"], params["bn1_b"], params["bn1_m"], params["bn1_v"])
    s2, b2 = _fold_bn(params["bn2_g"], params["bn2_b"], params["bn2_m"], params["bn2_v"])
    s3, b3 = _fold_bn(params["bn3_g"], params["bn3_b"], params["bn3_m"], params["bn3_v"])
    sf = jnp.float32(1.0 - p_drop)                            # ShakeDrop eval factor

    # Fold BN1 (input-channel) and BN2 (output-channel) scales into conv1's band,
    # and BN3*ShakeDrop scale into conv2's band.  Cast to bf16 (MXU-native operand dtype).
    wb1 = _band_weights(w1 * s1[None, None, :, None] * s2[None, None, None, :], W)
    wb1row = wb1.reshape(3 * W * Cin, W * Cout).astype(jnp.bfloat16)          # K-stacked dy taps
    wb2 = _band_weights(w2 * (s3 * sf)[None, None, None, :], W).astype(jnp.bfloat16)

    # BN1 bias passed through conv1: conv1 zero-pads BN1(x), so the bias contribution is
    # a position-dependent plane conv1(b1 * interior_mask); fold BN2's affine on top.
    b1_img = jnp.broadcast_to(b1[None, :, None, None], (1, Cin, H, W))
    bplane = lax.conv_general_dilated(
        b1_img, params["conv1_w"].astype(jnp.float32), (1, 1), ((1, 1), (1, 1)),
        dimension_numbers=("NCHW", "OIHW", "NCHW"))[0]                        # (Cout, H, W)
    bias2 = bplane * s2[:, None, None] + b2[:, None, None]
    bias2 = jnp.transpose(bias2, (1, 2, 0)).reshape(H, W * Cout)              # (H, W*Cout), f32
    bias3_row = jnp.tile(b3 * sf, W).reshape(1, W * Cout)                     # (1, W*Cout), f32

    # Batch-block size: stack NB samples per grid step so matmul M ~= NB*H (target <=256 rows).
    NB = max(1, min(N, max(1, 256 // H)))
    while N % NB != 0:
        NB -= 1
    grid = (N // NB,)
    WCi, WCo = W * Cin, W * Cout

    # im2row along H for conv1: rows are per-sample output rows, lanes stack the 3 dy taps.
    xp = jnp.pad(x, ((0, 0), (1, 1), (0, 0), (0, 0))).reshape(N, H + 2, WCi)
    xrow = jnp.concatenate([xp[:, 0:H], xp[:, 1:H + 1], xp[:, 2:H + 2]], axis=-1)
    xrow = xrow.reshape(N * H, 3 * WCi).astype(jnp.bfloat16)                  # (N*H, 3*W*Cin)

    # Channel-zero-padded shortcut with BN3 bias (scaled by ShakeDrop factor) folded in.
    short = jnp.pad(x, ((0, 0), (0, 0), (0, 0), (0, Cout - Cin))).reshape(N * H, WCo)
    short = short + bias3_row                                                  # (N*H, W*Cout), f32

    # Bias plane replicated across the NB samples of one grid step (position-dependent only).
    bias2_blk = jnp.tile(bias2, (NB, 1))                                       # (NB*H, W*Cout), f32

    def kernel(xrow_ref, short_ref, wb1_ref, wb2_ref, bias2_ref, o_ref):
        # ---- conv1 (+BN1/BN2 scales) as ONE MXU matmul: M=NB*H, K=3*W*Cin, N=W*Cout ----
        acc1 = jnp.dot(xrow_ref[...], wb1_ref[...], preferred_element_type=jnp.float32)
        h = jnp.maximum(acc1 + bias2_ref[...], 0.0).astype(jnp.bfloat16)

        # ---- conv2 (+BN3 scale, ShakeDrop factor): 3 full-M matmuls, then per-sample ----
        # row shifts (H zero-padding) combined directly into the output ref.
        a0 = jnp.dot(h, wb2_ref[0], preferred_element_type=jnp.float32)
        a1 = jnp.dot(h, wb2_ref[1], preferred_element_type=jnp.float32)
        a2 = jnp.dot(h, wb2_ref[2], preferred_element_type=jnp.float32)

        # Center tap + (shortcut with BN3 bias folded in), one lane-dense write.
        o_ref[...] = a1 + short_ref[...]
        for n in range(NB):          # static unroll; shifts never cross sample boundaries
            r = n * H
            o_ref[r + 1:r + H, :] = o_ref[r + 1:r + H, :] + a0[r:r + H - 1, :]
            o_ref[r:r + H - 1, :] = o_ref[r:r + H - 1, :] + a2[r + 1:r + H, :]

    out = pl.pallas_call(
        kernel,
        out_shape=jax.ShapeDtypeStruct((N * H, WCo), jnp.float32),
        grid_spec=pltpu.PrefetchScalarGridSpec(
            num_scalar_prefetch=0,
            grid=grid,
            in_specs=[
                pl.BlockSpec((NB * H, 3 * WCi), lambda b: (b, 0)),    # im2row input (bf16)
                pl.BlockSpec((NB * H, WCo), lambda b: (b, 0)),        # shortcut + bias3 (f32)
                pl.BlockSpec((3 * WCi, WCo), lambda b: (0, 0)),       # conv1 band, K-stacked
                pl.BlockSpec((3, WCo, WCo), lambda b: (0, 0, 0)),     # conv2 band
                pl.BlockSpec((NB * H, WCo), lambda b: (0, 0)),        # bias2 plane
            ],
            out_specs=pl.BlockSpec((NB * H, WCo), lambda b: (b, 0)),
        ),
        compiler_params=pltpu.CompilerParams(dimension_semantics=("parallel",)),
    )(xrow, short, wb1row, wb2, bias2_blk)

    out = out.reshape(N, H, W, Cout)
    return jnp.transpose(out, (0, 3, 1, 2))   # back to NCHW


def ref_forward(x, params, p_drop):
    """Plain-JAX reference (eval-mode BasicBlock), NCHW, f32 throughout."""
    def bn(h, g, b, m, v):
        inv = g / jnp.sqrt(v + EPS)
        return h * inv[None, :, None, None] + (b - m * inv)[None, :, None, None]

    dn = ('NCHW', 'OIHW', 'NCHW')
    h = bn(x, params["bn1_g"], params["bn1_b"], params["bn1_m"], params["bn1_v"])
    h = lax.conv_general_dilated(h, params["conv1_w"], (1, 1), ((1, 1), (1, 1)),
                                 dimension_numbers=dn)
    h = bn(h, params["bn2_g"], params["bn2_b"], params["bn2_m"], params["bn2_v"])
    h = jnp.maximum(h, 0.0)
    h = lax.conv_general_dilated(h, params["conv2_w"], (1, 1), ((1, 1), (1, 1)),
                                 dimension_numbers=dn)
    h = bn(h, params["bn3_g"], params["bn3_b"], params["bn3_m"], params["bn3_v"])
    h = (1.0 - p_drop) * h
    Cout, Cin = h.shape[1], x.shape[1]
    shortcut = x
    if Cout != Cin:
        pad = jnp.zeros((x.shape[0], Cout - Cin, h.shape[2], h.shape[3]), x.dtype)
        shortcut = jnp.concatenate([x, pad], axis=1)
    return h + shortcut


if __name__ == "__main__":
    N, inplanes, planes, H, W = 2, 4, 8, 16, 16
    p_shakedrop = 0.5

    key = jax.random.PRNGKey(0)
    ks = jax.random.split(key, 16)
    params = {
        "conv1_w": jax.random.normal(ks[0], (planes, inplanes, 3, 3), jnp.float32) * 0.2,
        "conv2_w": jax.random.normal(ks[1], (planes, planes, 3, 3), jnp.float32) * 0.2,
        "bn1_g": jax.random.uniform(ks[2], (inplanes,), jnp.float32, 0.5, 1.5),
        "bn1_b": jax.random.normal(ks[3], (inplanes,), jnp.float32) * 0.1,
        "bn1_m": jax.random.normal(ks[4], (inplanes,), jnp.float32) * 0.1,
        "bn1_v": jax.random.uniform(ks[5], (inplanes,), jnp.float32, 0.5, 1.5),
        "bn2_g": jax.random.uniform(ks[6], (planes,), jnp.float32, 0.5, 1.5),
        "bn2_b": jax.random.normal(ks[7], (planes,), jnp.float32) * 0.1,
        "bn2_m": jax.random.normal(ks[8], (planes,), jnp.float32) * 0.1,
        "bn2_v": jax.random.uniform(ks[9], (planes,), jnp.float32, 0.5, 1.5),
        "bn3_g": jax.random.uniform(ks[10], (planes,), jnp.float32, 0.5, 1.5),
        "bn3_b": jax.random.normal(ks[11], (planes,), jnp.float32) * 0.1,
        "bn3_m": jax.random.normal(ks[12], (planes,), jnp.float32) * 0.1,
        "bn3_v": jax.random.uniform(ks[13], (planes,), jnp.float32, 0.5, 1.5),
    }
    x = jax.random.normal(ks[15], (N, inplanes, H, W), jnp.float32)

    out = basic_block_forward(x, params, p_shakedrop)
    out = jax.block_until_ready(out)

    ref = jax.block_until_ready(ref_forward(x, params, p_shakedrop))
    # bf16 MXU operands (f32 accumulation) vs. f32 reference -> relaxed tolerance.
    np.testing.assert_allclose(np.asarray(out), np.asarray(ref), rtol=3e-2, atol=3e-2)

    print("KERNEL_OK")
</pallas_src>

<mosaic_0001>
module attributes {stable_mosaic.version = 11 : i64} {
  func.func @kernel(%arg0: i32, %arg1: memref<32x192xbf16, #tpu.memory_space<vmem>>, %arg2: memref<32x128xf32, #tpu.memory_space<vmem>>, %arg3: memref<192x128xbf16, #tpu.memory_space<vmem>>, %arg4: memref<3x128x128xbf16, #tpu.memory_space<vmem>>, %arg5: memref<32x128xf32, #tpu.memory_space<vmem>>, %arg6: memref<32x128xf32, #tpu.memory_space<vmem>>) attributes {dimension_semantics = [#tpu.dimension_semantics<parallel>], iteration_bounds = array<i64: 1>, scalar_prefetch = 0 : i64, scratch_operands = 0 : i64, tpu.core_type = #tpu.core_type<tc>, window_params = [{transform_indices = @transform_0, window_bounds = array<i64: 32, 192>}, {transform_indices = @transform_1, window_bounds = array<i64: 32, 128>}, {pipeline_mode = #tpu.pipeline_mode<synchronous>, transform_indices = @transform_2, window_bounds = array<i64: 192, 128>}, {pipeline_mode = #tpu.pipeline_mode<synchronous>, transform_indices = @transform_3, window_bounds = array<i64: 3, 128, 128>}, {pipeline_mode = #tpu.pipeline_mode<synchronous>, transform_indices = @transform_4, window_bounds = array<i64: 32, 128>}, {transform_indices = @transform_5, window_bounds = array<i64: 32, 128>}]} {
    %c0 = arith.constant 0 : index
    %c0_0 = arith.constant 0 : index
    %0 = vector.load %arg1[%c0, %c0_0] : memref<32x192xbf16, #tpu.memory_space<vmem>>, vector<32x192xbf16>
    %c0_1 = arith.constant 0 : index
    %c0_2 = arith.constant 0 : index
    %1 = vector.load %arg3[%c0_1, %c0_2] : memref<192x128xbf16, #tpu.memory_space<vmem>>, vector<192x128xbf16>
    %cst = arith.constant dense<0.000000e+00> : vector<32x128xf32>
    %2 = tpu.matmul %0, %1, %cst {dimension_numbers = #tpu.dot_dimension_numbers<[1], [0], [0], [1], [0, 0, 1, 1], [], []>} : vector<32x192xbf16>, vector<192x128xbf16>, vector<32x128xf32> -> vector<32x128xf32>
    %c0_3 = arith.constant 0 : index
    %c0_4 = arith.constant 0 : index
    %3 = vector.load %arg5[%c0_3, %c0_4] : memref<32x128xf32, #tpu.memory_space<vmem>>, vector<32x128xf32>
    %4 = arith.addf %2, %3 : vector<32x128xf32>
    %cst_5 = arith.constant 0.000000e+00 : f32
    %5 = vector.broadcast %cst_5 : f32 to vector<32x128xf32>
    %6 = arith.maximumf %4, %5 : vector<32x128xf32>
    %7 = arith.truncf %6 : vector<32x128xf32> to vector<32x128xbf16>
    %c0_6 = arith.constant 0 : index
    %c0_7 = arith.constant 0 : index
    %c0_8 = arith.constant 0 : index
    %8 = vector.load %arg4[%c0_6, %c0_7, %c0_8] : memref<3x128x128xbf16, #tpu.memory_space<vmem>>, vector<1x128x128xbf16>
    %9 = vector.shape_cast %8 : vector<1x128x128xbf16> to vector<128x128xbf16>
    %cst_9 = arith.constant dense<0.000000e+00> : vector<32x128xf32>
    %10 = tpu.matmul %7, %9, %cst_9 {dimension_numbers = #tpu.dot_dimension_numbers<[1], [0], [0], [1], [0, 0, 1, 1], [], []>} : vector<32x128xbf16>, vector<128x128xbf16>, vector<32x128xf32> -> vector<32x128xf32>
    %c1 = arith.constant 1 : index
    %c0_10 = arith.constant 0 : index
    %c0_11 = arith.constant 0 : index
    %11 = vector.load %arg4[%c1, %c0_10, %c0_11] : memref<3x128x128xbf16, #tpu.memory_space<vmem>>, vector<1x128x128xbf16>
    %12 = vector.shape_cast %11 : vector<1x128x128xbf16> to vector<128x128xbf16>
    %cst_12 = arith.constant dense<0.000000e+00> : vector<32x128xf32>
    %13 = tpu.matmul %7, %12, %cst_12 {dimension_numbers = #tpu.dot_dimension_numbers<[1], [0], [0], [1], [0, 0, 1, 1], [], []>} : vector<32x128xbf16>, vector<128x128xbf16>, vector<32x128xf32> -> vector<32x128xf32>
    %c2 = arith.constant 2 : index
    %c0_13 = arith.constant 0 : index
    %c0_14 = arith.constant 0 : index
    %14 = vector.load %arg4[%c2, %c0_13, %c0_14] : memref<3x128x128xbf16, #tpu.memory_space<vmem>>, vector<1x128x128xbf16>
    %15 = vector.shape_cast %14 : vector<1x128x128xbf16> to vector<128x128xbf16>
    %cst_15 = arith.constant dense<0.000000e+00> : vector<32x128xf32>
    %16 = tpu.matmul %7, %15, %cst_15 {dimension_numbers = #tpu.dot_dimension_numbers<[1], [0], [0], [1], [0, 0, 1, 1], [], []>} : vector<32x128xbf16>, vector<128x128xbf16>, vector<32x128xf32> -> vector<32x128xf32>
    %c0_16 = arith.constant 0 : index
    %c0_17 = arith.constant 0 : index
    %17 = vector.load %arg2[%c0_16, %c0_17] : memref<32x128xf32, #tpu.memory_space<vmem>>, vector<32x128xf32>
    %18 = arith.addf %13, %17 : vector<32x128xf32>
    %c0_18 = arith.constant 0 : index
    %c0_19 = arith.constant 0 : index
    %19 = vector.load %arg6[%c0_18, %c0_19] : memref<32x128xf32, #tpu.memory_space<vmem>>, vector<32x128xf32>
    tpu.vector_store %arg6[%c0_18, %c0_19], %18 {strides = array<i32>} : memref<32x128xf32, #tpu.memory_space<vmem>>, vector<32x128xf32>,
    %c1_20 = arith.constant 1 : index
    %c0_21 = arith.constant 0 : index
    %20 = vector.load %arg6[%c1_20, %c0_21] : memref<32x128xf32, #tpu.memory_space<vmem>>, vector<15x128xf32>
    %21 = vector.extract_strided_slice %10 {offsets = [0, 0], sizes = [15, 128], strides = [1, 1]} : vector<32x128xf32> to vector<15x128xf32>
    %22 = arith.addf %20, %21 : vector<15x128xf32>
    %c1_22 = arith.constant 1 : index
    %c0_23 = arith.constant 0 : index
    %23 = vector.load %arg6[%c1_22, %c0_23] : memref<32x128xf32, #tpu.memory_space<vmem>>, vector<15x128xf32>
    tpu.vector_store %arg6[%c1_22, %c0_23], %22 {strides = array<i32>} : memref<32x128xf32, #tpu.memory_space<vmem>>, vector<15x128xf32>,
    %c0_24 = arith.constant 0 : index
    %c0_25 = arith.constant 0 : index
    %24 = vector.load %arg6[%c0_24, %c0_25] : memref<32x128xf32, #tpu.memory_space<vmem>>, vector<15x128xf32>
    %25 = vector.extract_strided_slice %16 {offsets = [1, 0], sizes = [15, 128], strides = [1, 1]} : vector<32x128xf32> to vector<15x128xf32>
    %26 = arith.addf %24, %25 : vector<15x128xf32>
    %c0_26 = arith.constant 0 : index
    %c0_27 = arith.constant 0 : index
    %27 = vector.load %arg6[%c0_26, %c0_27] : memref<32x128xf32, #tpu.memory_space<vmem>>, vector<15x128xf32>
    tpu.vector_store %arg6[%c0_26, %c0_27], %26 {strides = array<i32>} : memref<32x128xf32, #tpu.memory_space<vmem>>, vector<15x128xf32>,
    %c17 = arith.constant 17 : index
    %c0_28 = arith.constant 0 : index
    %28 = vector.load %arg6[%c17, %c0_28] : memref<32x128xf32, #tpu.memory_space<vmem>>, vector<15x128xf32>
    %29 = vector.extract_strided_slice %10 {offsets = [16, 0], sizes = [15, 128], strides = [1, 1]} : vector<32x128xf32> to vector<15x128xf32>
    %30 = arith.addf %28, %29 : vector<15x128xf32>
    %c17_29 = arith.constant 17 : index
    %c0_30 = arith.constant 0 : index
    %31 = vector.load %arg6[%c17_29, %c0_30] : memref<32x128xf32, #tpu.memory_space<vmem>>, vector<15x128xf32>
    tpu.vector_store %arg6[%c17_29, %c0_30], %30 {strides = array<i32>} : memref<32x128xf32, #tpu.memory_space<vmem>>, vector<15x128xf32>,
    %c16 = arith.constant 16 : index
    %c0_31 = arith.constant 0 : index
    %32 = vector.load %arg6[%c16, %c0_31] : memref<32x128xf32, #tpu.memory_space<vmem>>, vector<15x128xf32>
    %33 = vector.extract_strided_slice %16 {offsets = [17, 0], sizes = [15, 128], strides = [1, 1]} : vector<32x128xf32> to vector<15x128xf32>
    %34 = arith.addf %32, %33 : vector<15x128xf32>
    %c16_32 = arith.constant 16 : index
    %c0_33 = arith.constant 0 : index
    %35 = vector.load %arg6[%c16_32, %c0_33] : memref<32x128xf32, #tpu.memory_space<vmem>>, vector<15x128xf32>
    tpu.vector_store %arg6[%c16_32, %c0_33], %34 {strides = array<i32>} : memref<32x128xf32, #tpu.memory_space<vmem>>, vector<15x128xf32>,
    return
  }
  func.func @transform_0(%arg0: i32) -> (i32, i32) {
    %c0_i32 = arith.constant 0 : i32
    %c0_i32_0 = arith.constant 0 : i32
    return %arg0, %c0_i32 : i32, i32
  }
  func.func @transform_1(%arg0: i32) -> (i32, i32) {
    %c0_i32 = arith.constant 0 : i32
    %c0_i32_0 = arith.constant 0 : i32
    return %arg0, %c0_i32 : i32, i32
  }
  func.func @transform_2(%arg0: i32) -> (i32, i32) {
    %c0_i32 = arith.constant 0 : i32
    %c0_i32_0 = arith.constant 0 : i32
    %c0_i32_1 = arith.constant 0 : i32
    return %c0_i32, %c0_i32_0 : i32, i32
  }
  func.func @transform_3(%arg0: i32) -> (i32, i32, i32) {
    %c0_i32 = arith.constant 0 : i32
    %c0_i32_0 = arith.constant 0 : i32
    %c0_i32_1 = arith.constant 0 : i32
    %c0_i32_2 = arith.constant 0 : i32
    return %c0_i32, %c0_i32_0, %c0_i32_1 : i32, i32, i32
  }
  func.func @transform_4(%arg0: i32) -> (i32, i32) {
    %c0_i32 = arith.constant 0 : i32
    %c0_i32_0 = arith.constant 0 : i32
    %c0_i32_1 = arith.constant 0 : i32
    return %c0_i32, %c0_i32_0 : i32, i32
  }
  func.func @transform_5(%arg0: i32) -> (i32, i32) {
    %c0_i32 = arith.constant 0 : i32
    %c0_i32_0 = arith.constant 0 : i32
    return %arg0, %c0_i32 : i32, i32
  }
}

</mosaic_0001>

<bundles_post_ra>
// kernel: tpu_custom_call.1
= control target key start
LH: loop header
LB: loop body
LE: loop exit
PB: predicated region body
PF: predicated region fallthrough
CT: control target
= control target key end

     0   :  { %10 = vsyncpa [#allocation3], 0  ;;  %s1069_s0 = inlined_call_operand.hbm [shape: bf16[32,192], index: 0, kind: input, shape index: {}]   ;;  %s1070_s1 = inlined_call_operand.hbm [shape: f32[32,128], index: 1, kind: input, shape index: {}]   ;;  %s1071_s2 = inlined_call_operand.hbm [shape: bf16[192,128], index: 2, kind: input, shape index: {}]   ;;  %s1072_s3 = inlined_call_operand.hbm [shape: bf16[3,128,128], index: 3, kind: input, shape index: {}]   ;;  %s1073_s4 = inlined_call_operand.hbm [shape: f32[32,128], index: 4, kind: input, shape index: {}]   ;;  %s1074_s5 = inlined_call_operand.hbm [shape: f32[32,128], index: 5, kind: output, shape index: {}]  }
   0x1   :  { %11 = vsyncpa [#allocation6], 0 }
   0x2   :  { %12 = vsyncpa [#allocation9], 0 }
   0x3   :  { %13 = vsyncpa [#allocation4], 0  ;;  %s994_s18 = smov [#allocation5]  }
   0x4   :  { %s31_s19 = sshll.u32 %s994_s18, 4  ;;  %s32_s19 = int_to_ptr.vmem [resolvable:$true] %s31_s19 }
   0x5   :  { %s874_s20 = scalar_lea.vmem %s32_s19, 512  ;;  %p879_p1 = scmp.lt.s32.totalorder %s32_s19, %s32_s19 }
   0x6   :  { %p875_p0 = scmp.ne.s32.totalorder %s32_s19, %s874_s20  ;;  %p880_p2 = scmp.lt.s32.totalorder %s874_s20, %s874_s20 }
   0x8   :  { %p881_p3 = por %p880_p2, %p879_p1 }
   0xa   :  { %p882_p4 = pnand %p881_p3, %p875_p0 }
   0xc   :  { %885 = shalt.err (!%p882_p4)
}
   0xd   :  { %s995_s21 = smov 128   ;;  %s996_s22 = smov 8  }
   0xe   :  { %37 = dma.hbm_to_vmem [thread:$0]  %s1070_s1, 512, %s32_s19, [#allocation6], %s995_s21, %s995_s21, %s996_s22  }
   0xf   :  { %s997_s25 = smov [#allocation8]   ;;  %s998_s27 = smov [#allocation2]  }
  0x10   :  { %s55_s26 = sshll.u32 %s997_s25, 4  ;;  %s19_s28 = sshll.u32 %s998_s27, 4  ;;  %s56_s26 = int_to_ptr.vmem [resolvable:$true] %s55_s26  ;;  %s20_s28 = int_to_ptr.vmem [resolvable:$true] %s19_s28 }
  0x11   :  { %s894_s29 = scalar_lea.vmem %s56_s26, 3072  ;;  %p899_p6 = scmp.lt.s32.totalorder %s56_s26, %s56_s26 }
  0x12   :  { %p895_p5 = scmp.ne.s32.totalorder %s56_s26, %s894_s29  ;;  %p900_p7 = scmp.lt.s32.totalorder %s894_s29, %s894_s29 }
  0x14   :  { %p901_p8 = por %p900_p7, %p899_p6 }
  0x16   :  { %p902_p9 = pnand %p901_p8, %p895_p5 }
  0x18   :  { %905 = shalt.err (!%p902_p9)
}
  0x19   :  { %s999_s30 = smov 64   ;;  %s1000_s6 = smov 4  }
  0x1a   :  { %61 = dma.hbm_to_vmem [thread:$0]  %s1072_s3, 3072, %s56_s26, [#allocation9], %s999_s30, %s999_s30, %s1000_s6  }
  0x1b   :  { %s914_s1 = scalar_lea.vmem %s20_s28, 512  ;;  %p919_p11 = scmp.lt.s32.totalorder %s20_s28, %s20_s28 }
  0x1c   :  { %p915_p10 = scmp.ne.s32.totalorder %s20_s28, %s914_s1  ;;  %p920_p12 = scmp.lt.s32.totalorder %s914_s1, %s914_s1 }
  0x1e   :  { %p921_p13 = por %p920_p12, %p919_p11 }
  0x20   :  { %p922_p0 = pnand %p921_p13, %p915_p10 }
  0x22   :  { %925 = shalt.err (!%p922_p0)
}
  0x23   :  { %25 = dma.hbm_to_vmem [thread:$0]  %s1069_s0, 512, %s20_s28, [#allocation3], %s995_s21, %s995_s21, %s996_s22  }
  0x24   :  { %s1001_s11 = smov [#allocation7]   ;;  %s1002_s13 = smov [#allocation10]  }
  0x25   :  { %s43_s12 = sshll.u32 %s1001_s11, 4  ;;  %s67_s3 = sshll.u32 %s1002_s13, 4  ;;  %s44_s12 = int_to_ptr.vmem [resolvable:$true] %s43_s12  ;;  %s68_s3 = int_to_ptr.vmem [resolvable:$true] %s67_s3 }
  0x26   :  { %s934_s14 = scalar_lea.vmem %s44_s12, 1536  ;;  %p939_p2 = scmp.lt.s32.totalorder %s44_s12, %s44_s12 }
  0x27   :  { %p935_p1 = scmp.ne.s32.totalorder %s44_s12, %s934_s14  ;;  %p940_p3 = scmp.lt.s32.totalorder %s934_s14, %s934_s14 }
  0x29   :  { %p941_p4 = por %p940_p3, %p939_p2 }
  0x2b   :  { %p942_p5 = pnand %p941_p4, %p935_p1 }
  0x2d   :  { %945 = shalt.err (!%p942_p5)
}
  0x2e   :  { %49 = dma.hbm_to_vmem [thread:$0]  %s1071_s2, 1536, %s44_s12, [#allocation6], %s999_s30, %s999_s30, %s1000_s6  }
  0x2f   :  { %s954_s17 = scalar_lea.vmem %s68_s3, 512  ;;  %p959_p7 = scmp.lt.s32.totalorder %s68_s3, %s68_s3 }
  0x30   :  { %p955_p6 = scmp.ne.s32.totalorder %s68_s3, %s954_s17  ;;  %p960_p8 = scmp.lt.s32.totalorder %s954_s17, %s954_s17 }
  0x32   :  { %p961_p9 = por %p960_p8, %p959_p7 }
  0x34   :  { %p962_p10 = pnand %p961_p9, %p955_p6 }
  0x36   :  { %965 = shalt.err (!%p962_p10)
}
  0x37   :  { %73 = dma.hbm_to_vmem [thread:$0]  %s1073_s4, 512, %s68_s3, [#allocation9], %s995_s21, %s995_s21, %s996_s22  }
  0x38   :  { %986 = dma.done.wait [#allocation3], 512  }
  0x39   :  { %987 = vsyncadd [#allocation3], 4294966784 }
  0x3a   :  { %988 = dma.done.wait [#allocation6], 2048  }
  0x3b   :  { %989 = vsyncadd [#allocation6], 4294965248 }
  0x3c   :  { %990 = dma.done.wait [#allocation9], 3584  }
  0x3d   :  { %991 = vsyncadd [#allocation9], 4294963712  ;;  %v1003_v0 = vmov 0   ;;  %v824_v1 = vld [vmem:[#allocation7 + $0x38] sm:$0xff]   ;;  %v825_v2 = vld [vmem:[#allocation7 + $0x30] sm:$0xff]   ;;  %vm212_vm0 = vcmask 523264  }
  0x3e   :  { %219 = vmatprep.subr.bf16.mxu0 %v1003_v0  ;;  %v826_v3 = vld [vmem:[#allocation7 + $0x28] sm:$0xff]   ;;  %v827_v4 = vld [vmem:[#allocation7 + $0x20] sm:$0xff]   ;;  %v828_v6 = vld [vmem:[#allocation7 + $0x18] sm:$0xff]   ;;  %vm633_vm1 = vcmask 1046528   ;;  %s1004_s2 = smov [#allocation11]  }
  0x3f   :  { %220 = vmatpush1.bf16.msra.mxu0 %v824_v1  ;;  %v838_v5 = vld [vmem:[#allocation2 + $0x4] ss:$8 sps:$4 sm:$0xff]   ;;  %v842_v7 = vld [vmem:[#allocation8 + $0x38] sm:$0xff]   ;;  %v844_v8 = vld [vmem:[#allocation8 + $0x30] sm:$0xff]   ;;  %s667_s4 = sshll.u32 %s1004_s2, 4  ;;  %s668_s4 = int_to_ptr.vmem [resolvable:$true] %s667_s4 }
  0x40   :  { %221 = vmatprep.subr.bf16.mxu0 %v1003_v0  ;;  %697 = vmatprep.mubr.msk.bf16.mxu0 %vm212_vm0, %v838_v5  ;;  %v829_v9 = vld [vmem:[#allocation7 + $0x10] sm:$0xff]   ;;  %v846_v10 = vld [vmem:[#allocation8 + $0x28] sm:$0xff]   ;;  %v848_v12 = vld [vmem:[#allocation8 + $0x20] sm:$0xff]   ;;  %s966_s19 = scalar_lea.vmem %s668_s4, 512  ;;  %p971_p12 = scmp.lt.s32.totalorder %s668_s4, %s668_s4 }
  0x41   :  { %753 = vmatprep.subr.bf16.mxu1 %v842_v7  ;;  %v830_v11 = vld [vmem:[#allocation7 + $0x8] sm:$0xff]   ;;  %v831_v13 = vld [vmem:[#allocation7] sm:$0xff]   ;;  %v832_v14 = vld [vmem:[#allocation7 + $0x58] sm:$0xff]   ;;  %p967_p11 = scmp.ne.s32.totalorder %s668_s4, %s966_s19  ;;  %p972_p13 = scmp.lt.s32.totalorder %s966_s19, %s966_s19 }
  0x42   :  { %754 = vmatpush3.bf16.msra.mxu1 %v842_v7  ;;  %v833_v15 = vld [vmem:[#allocation7 + $0x50] sm:$0xff]   ;;  %v834_v16 = vld [vmem:[#allocation7 + $0x48] sm:$0xff]   ;;  %v835_v17 = vld [vmem:[#allocation7 + $0x40] sm:$0xff]  }
  0x43   :  { %222 = vmatpush1.bf16.msra.mxu0 %v825_v2  ;;  %755 = vmatprep.subr.bf16.mxu1 %v844_v8  ;;  %v843_v18 = vld [vmem:[#allocation8 + $0x78] sm:$0xff]   ;;  %v836_v19 = vld [vmem:[#allocation2] ss:$8 sps:$4 sm:$0xff]   ;;  %v845_v21 = vld [vmem:[#allocation8 + $0x70] sm:$0xff]   ;;  %p973_p0 = por %p972_p13, %p971_p12 }
  0x44   :  { %223 = vmatprep.subr.bf16.mxu0 %v1003_v0  ;;  %v839_v20 = vld [vmem:[#allocation2 + $0x14] ss:$8 sps:$4 sm:$0xff]   ;;  %v847_v22 = vld [vmem:[#allocation8 + $0x68] sm:$0xff]   ;;  %v841_v23 = vld [vmem:[#allocation2 + $0x10] ss:$8 sps:$4 sm:$0xff]  }
  0x45   :  { %v849_v24 = vld [vmem:[#allocation8 + $0x60] sm:$0xff]   ;;  %v850_v25 = vld [vmem:[#allocation8 + $0x18] sm:$0xff]   ;;  %v852_v27 = vld [vmem:[#allocation8 + $0x10] sm:$0xff]   ;;  %p974_p1 = pnand %p973_p0, %p967_p11 }
  0x46   :  { %756 = vmatpush3.bf16.msra.mxu1 %v844_v8  ;;  %v851_v26 = vld [vmem:[#allocation8 + $0x58] sm:$0xff]   ;;  %v853_v28 = vld [vmem:[#allocation8 + $0x50] sm:$0xff]   ;;  %v854_v29 = vld [vmem:[#allocation8 + $0x8] sm:$0xff]  }
  0x47   :  { %224 = vmatpush1.bf16.msra.mxu0 %v826_v3  ;;  %757 = vmatprep.subr.bf16.mxu1 %v846_v10  ;;  %v855_v30 = vld [vmem:[#allocation8 + $0x48] sm:$0xff]   ;;  %v856_v31 = vld [vmem:[#allocation8] sm:$0xff]   ;;  %v858_v33 = vld [vmem:[#allocation8 + $0xb8] sm:$0xff]  }
  0x48   :  { %225 = vmatprep.subr.bf16.mxu0 %v1003_v0  ;;  %v857_v32 = vld [vmem:[#allocation8 + $0x40] sm:$0xff]   ;;  %v119_v37 = vld [vmem:[#allocation10 + $0x8] sm:$0xff]  ;;  %v120_v44 = vld [vmem:[#allocation10 + $0x10] sm:$0xff] }
  0x49   :  { %v118_v34 = vld [vmem:[#allocation10] sm:$0xff]  ;;  %v121_v48 = vld [vmem:[#allocation10 + $0x18] sm:$0xff]  ;;  %v859_v56 = vld [vmem:[#allocation8 + $0xb0] sm:$0xff]  }
  0x4a   :  { %758 = vmatpush3.bf16.msra.mxu1 %v846_v10  ;;  %v860_v57 = vld [vmem:[#allocation8 + $0xa8] sm:$0xff]   ;;  %v861_v58 = vld [vmem:[#allocation8 + $0xa0] sm:$0xff]   ;;  %v862_v59 = vld [vmem:[#allocation8 + $0x98] sm:$0xff]  }
  0x4b   :  { %226 = vmatpush1.bf16.msra.mxu0 %v827_v4  ;;  %759 = vmatprep.subr.bf16.mxu1 %v848_v12  ;;  %v863_v60 = vld [vmem:[#allocation8 + $0x90] sm:$0xff]   ;;  %v864_v61 = vld [vmem:[#allocation8 + $0x88] sm:$0xff]   ;;  %v865_v62 = vld [vmem:[#allocation8 + $0x80] sm:$0xff]  }
  0x4c   :  { %227 = vmatprep.subr.bf16.mxu0 %v1003_v0  ;;  %v520_v63 = vld [vmem:[#allocation5 + $0x10] sm:$0xff]  ;;  %v518_v1 = vld [vmem:[#allocation5] sm:$0xff]  ;;  %v521_v4 = vld [vmem:[#allocation5 + $0x18] sm:$0xff] }
  0x4d   :  { %v519_v8 = vld [vmem:[#allocation5 + $0x8] sm:$0xff] }
  0x4e   :  { %760 = vmatpush3.bf16.msra.mxu1 %v848_v12 }
  0x4f   :  { %228 = vmatpush1.bf16.msra.mxu0 %v828_v6  ;;  %761 = vmatprep.subr.bf16.mxu1 %v850_v25 }
  0x50   :  { %229 = vmatprep.subr.bf16.mxu0 %v1003_v0 }
  0x52   :  { %762 = vmatpush3.bf16.msra.mxu1 %v850_v25 }
  0x53   :  { %230 = vmatpush1.bf16.msra.mxu0 %v829_v9  ;;  %763 = vmatprep.subr.bf16.mxu1 %v852_v27 }
  0x54   :  { %231 = vmatprep.subr.bf16.mxu0 %v1003_v0 }
  0x56   :  { %764 = vmatpush3.bf16.msra.mxu1 %v852_v27 }
  0x57   :  { %232 = vmatpush1.bf16.msra.mxu0 %v830_v11  ;;  %765 = vmatprep.subr.bf16.mxu1 %v854_v29 }
  0x58   :  { %233 = vmatprep.subr.bf16.mxu0 %v1003_v0 }
  0x5a   :  { %766 = vmatpush3.bf16.msra.mxu1 %v854_v29 }
  0x5b   :  { %234 = vmatpush1.bf16.msra.mxu0 %v831_v13  ;;  %767 = vmatprep.subr.bf16.mxu1 %v856_v31 }
  0x5c   :  { %243 = vmatprep.subr.bf16.mxu0 %v1003_v0 }
  0x5e   :  { %768 = vmatpush3.bf16.msra.mxu1 %v856_v31 }
  0x5f   :  { %244 = vmatpush2.bf16.msra.mxu0 %v832_v14  ;;  %773 = vmatprep.subr.bf16.mxu1 %v858_v33 }
  0x60   :  { %245 = vmatprep.subr.bf16.mxu0 %v1003_v0 }
  0x63   :  { %246 = vmatpush2.bf16.msra.mxu0 %v833_v15 }
  0x64   :  { %247 = vmatprep.subr.bf16.mxu0 %v1003_v0 }
  0x67   :  { %248 = vmatpush2.bf16.msra.mxu0 %v834_v16 }
  0x68   :  { %249 = vmatprep.subr.bf16.mxu0 %v1003_v0 }
  0x6b   :  { %250 = vmatpush2.bf16.msra.mxu0 %v835_v17 }
  0x6c   :  { %793 = vmatprep.subr.bf16.mxu0 %v843_v18 }
  0x6e   :  { %252 = vmatmul.mubr.bf16.vlgmr.msra.gmra.mxu0 %v836_v19 }
  0x6f   :  { %698 = vmatprep.mubr.msk.bf16.mxu0 %vm212_vm0, %v839_v20  ;;  %794 = vmatpush3.bf16.msra.mxu0 %v843_v18 }
  0x70   :  { %795 = vmatprep.subr.bf16.mxu0 %v845_v21 }
  0x73   :  { %796 = vmatpush3.bf16.msra.mxu0 %v845_v21 }
  0x74   :  { %797 = vmatprep.subr.bf16.mxu0 %v847_v22 }
  0x76   :  { %260 = vmatmul.mubr.bf16.gmra.mxu0 %v841_v23 }
  0x77   :  { %798 = vmatpush3.bf16.msra.mxu0 %v847_v22 }
  0x78   :  { %799 = vmatprep.subr.bf16.mxu0 %v849_v24 }
  0x7b   :  { %800 = vmatpush3.bf16.msra.mxu0 %v849_v24 }
  0x7c   :  { %801 = vmatprep.subr.bf16.mxu0 %v851_v26 }
  0x7f   :  { %802 = vmatpush3.bf16.msra.mxu0 %v851_v26 }
  0x80   :  { %803 = vmatprep.subr.bf16.mxu0 %v853_v28 }
  0x83   :  { %804 = vmatpush3.bf16.msra.mxu0 %v853_v28 }
  0x84   :  { %805 = vmatprep.subr.bf16.mxu0 %v855_v30 }
  0x87   :  { %806 = vmatpush3.bf16.msra.mxu0 %v855_v30 }
  0x88   :  { %807 = vmatprep.subr.bf16.mxu0 %v857_v32 }
  0x8b   :  { %808 = vmatpush3.bf16.msra.mxu0 %v857_v32 }
 0x12e   :  { %v253_v35 = vpop.f32.mrf.mxu0 }
 0x12f   :  { %v254_v38 = vadd.f32 %v253_v35, %v118_v34 }
 0x130   :  { %v255_v36 = vpop.f32.mrf.mxu0 }
 0x131   :  { %v268_v42 = vmax.f32 %v254_v38, 0.0 }
 0x132   :  { %v256_v39 = vpop.f32.mrf.mxu0 }
 0x133   :  { %v257_v40 = vadd.f32 %v256_v39, %v119_v37 }
 0x134   :  { %v258_v41 = vpop.f32.mrf.mxu0 }
 0x135   :  { %v269_v43 = vmax.f32 %v257_v40, 0.0 }
 0x136   :  { %v261_v45 = vpop.f32.mrf.mxu0 }
 0x137   :  { %v272_v46 = vpack.c.bf16 %v269_v43, %v268_v42  ;;  %v262_v49 = vadd.f32 %v261_v45, %v120_v44 }
 0x138   :  { %v263_v47 = vpop.f32.mrf.mxu0 }
 0x139   :  { %769 = vmatprep.mubr.bf16.mxu1 %v272_v46  ;;  %809 = vmatprep.mubr.bf16.mxu0 %v272_v46  ;;  %v270_v53 = vmax.f32 %v262_v49, 0.0 }
 0x13a   :  { %v264_v50 = vpop.f32.mrf.mxu0 }
 0x13b   :  { %v265_v51 = vadd.f32 %v264_v50, %v121_v48 }
 0x13c   :  { %v266_v52 = vpop.f32.mrf.mxu0 }
 0x13d   :  { %v271_v54 = vmax.f32 %v265_v51, 0.0 }
 0x13f   :  { %v273_v55 = vpack.c.bf16 %v271_v54, %v270_v53 }
 0x141   :  { %770 = vmatmul.mubr.bf16.vlgmr.msra.gmra.mxu1 %v273_v55  ;;  %810 = vmatmul.mubr.bf16.vlgmr.msra.gmra.mxu0 %v273_v55 }
 0x142   :  { %774 = vmatpush3.bf16.msra.mxu1 %v858_v33  ;;  %789 = vmatprep.mubr.bf16.mxu1 %v272_v46 }
 0x143   :  { %775 = vmatprep.subr.bf16.mxu1 %v859_v56 }
 0x146   :  { %776 = vmatpush3.bf16.msra.mxu1 %v859_v56 }
 0x147   :  { %777 = vmatprep.subr.bf16.mxu1 %v860_v57 }
 0x14a   :  { %778 = vmatpush3.bf16.msra.mxu1 %v860_v57 }
 0x14b   :  { %779 = vmatprep.subr.bf16.mxu1 %v861_v58 }
 0x14e   :  { %780 = vmatpush3.bf16.msra.mxu1 %v861_v58 }
 0x14f   :  { %781 = vmatprep.subr.bf16.mxu1 %v862_v59 }
 0x152   :  { %782 = vmatpush3.bf16.msra.mxu1 %v862_v59 }
 0x153   :  { %783 = vmatprep.subr.bf16.mxu1 %v863_v60 }
 0x156   :  { %784 = vmatpush3.bf16.msra.mxu1 %v863_v60 }
 0x157   :  { %785 = vmatprep.subr.bf16.mxu1 %v864_v61 }
 0x15a   :  { %786 = vmatpush3.bf16.msra.mxu1 %v864_v61 }
 0x15b   :  { %787 = vmatprep.subr.bf16.mxu1 %v865_v62 }
 0x15e   :  { %788 = vmatpush3.bf16.msra.mxu1 %v865_v62 }
 0x161   :  { %790 = vmatmul.mubr.bf16.vlgmr.msra.gmra.mxu1 %v273_v55 }
 0x201   :  { %v811_v0 = vpop.f32.mrf.mxu0  ;;  %v771_v6 = vpop.f32.mrf.mxu1 }
 0x202   :  { %v613_v2 = vadd.f32 %v811_v0, %v520_v63 }
 0x203   :  { %v604_v3 = vpop.f32.mrf.mxu0  ;;  %v372_v12 = vpop.f32.mrf.mxu1 }
 0x204   :  { %621 = vst [vmem:[#allocation11 + $0x10] sm:$0xff] %v613_v2  ;;  %v605_v5 = vadd.f32 %v604_v3, %v518_v1 }
 0x205   :  { %v812_v7 = vpop.f32.mrf.mxu0  ;;  %v772_v13 = vpop.f32.mrf.mxu1 }
 0x206   :  { %619 = vst [vmem:[#allocation11] sm:$0xff] %v605_v5  ;;  %v616_v9 = vadd.f32 %v812_v7, %v521_v4 }
 0x207   :  { %v607_v10 = vpop.f32.mrf.mxu0  ;;  %v375_v18 = vpop.f32.mrf.mxu1 }
 0x208   :  { %622 = vst [vmem:[#allocation11 + $0x18] sm:$0xff] %v616_v9  ;;  %v608_v11 = vadd.f32 %v607_v10, %v519_v8 }
 0x20a   :  { %620 = vst [vmem:[#allocation11 + $0x8] sm:$0xff] %v608_v11 }
 0x20f   :  { %v643_v14 = vld [vmem:[#allocation11 + $0x11] sm:$0xff]  ;;  %v644_v15 = vld [vmem:[#allocation11 + $0x19] sm:$0x7f] }
 0x210   :  { %v645_v16 = vadd.f32 %v771_v6, %v643_v14  ;;  %v646_v17 = vadd.f32 %v772_v13, %v644_v15 }
 0x211   :  { %v623_v19 = vld [vmem:[#allocation11 + $0x1] sm:$0xff]  ;;  %v624_v20 = vld [vmem:[#allocation11 + $0x9] sm:$0x7f] }
 0x212   :  { %647 = vst [vmem:[#allocation11 + $0x11] sm:$0xff] %v645_v16  ;;  %648 = vst [vmem:[#allocation11 + $0x19] sm:$0x7f] %v646_v17  ;;  %v625_v21 = vadd.f32 %v623_v19, %v372_v12  ;;  %v626_v22 = vadd.f32 %v624_v20, %v375_v18 }
 0x214   :  { %627 = vst [vmem:[#allocation11 + $0x1] sm:$0xff] %v625_v21  ;;  %628 = vst [vmem:[#allocation11 + $0x9] sm:$0x7f] %v626_v22 }
 0x219   :  { %v650_v28 = vld [vmem:[#allocation11 + $0x18] sm:$0x7f]  ;;  %v649_v31 = vld [vmem:[#allocation11 + $0x10] sm:$0xff] }
 0x21b   :  { %v630_v36 = vld [vmem:[#allocation11 + $0x8] sm:$0x7f]  ;;  %v629_v37 = vld [vmem:[#allocation11] sm:$0xff] }
 0x221   :  { %v791_v23 = vpop.f32.mrf.mxu1 }
 0x222   :  { %v653_v26 = vrot.slane %v791_v23, 1 }
 0x223   :  { %v503_v24 = vpop.f32.mrf.mxu1 }
 0x224   :  { %v634_v30 = vrot.slane %v503_v24, 1 }
 0x225   :  { %v792_v25 = vpop.f32.mrf.mxu1 }
 0x226   :  { %v654_v27 = vrot.slane %v792_v25, 1 }
 0x227   :  { %v506_v29 = vpop.f32.mrf.mxu1 }
 0x228   :  { %v655_v32 = vsel %vm633_vm1, %v653_v26, %v654_v27  ;;  %v659_v33 = vadd.f32 %v654_v27, %v650_v28  ;;  %v635_v34 = vrot.slane %v506_v29, 1 }
 0x229   :  { %v658_v35 = vadd.f32 %v655_v32, %v649_v31 }
 0x22a   :  { %661 = vst [vmem:[#allocation11 + $0x18] sm:$0x7f] %v659_v33  ;;  %v636_v38 = vsel %vm633_vm1, %v634_v30, %v635_v34  ;;  %v640_v39 = vadd.f32 %v635_v34, %v630_v36 }
 0x22b   :  { %660 = vst [vmem:[#allocation11 + $0x10] sm:$0xff] %v658_v35  ;;  %v639_v40 = vadd.f32 %v636_v38, %v629_v37 }
 0x22c   :  { %642 = vst [vmem:[#allocation11 + $0x8] sm:$0x7f] %v640_v39 }
 0x22d   :  { %641 = vst [vmem:[#allocation11] sm:$0xff] %v639_v40 }
 0x22e   :  { %977 = shalt.err (!%p974_p1)
}
 0x22f   :  { %673 = dma.vmem_to_hbm [thread:$0]  %s668_s4, 512, %s1074_s5, [#allocation4], %s995_s21, %s995_s21, %s996_s22  }
 0x230   :  { %992 = dma.done.wait [#allocation4], 512  }
 0x231   :  { %993 = vsyncadd [#allocation4], 4294966784 }
 0x232   :  { %677 = vsyncpa [#allocation3], 1 }
 0x233   :  { %678 = vsyncpa [#allocation6], 1 }
 0x234   :  { %679 = vsyncpa [#allocation9], 1 }
 0x235   :  { %680 = vsyncpa [#allocation4], 1 }

</bundles_post_ra>
